<compile_context>
chip_gen: v5e
topology: v5e:2x2
jax: 0.10.0
libtpu: 0.0.40
codegen_flags: <defaults>
</compile_context>

<pallas_src>
import functools

import jax
import jax.numpy as jnp
from jax.experimental import pallas as pl
from jax.experimental.pallas import tpu as pltpu


def _round_up(n, m):
    return ((n + m - 1) // m) * m


# ----------------------------------------------------------------------------
# Pallas kernel: Kt fused forward-Euler steps per grid iteration.
# ----------------------------------------------------------------------------
def semiflow_kernel(x_ref, w1_ref, b1_ref, w2_ref, b2_ref, out_ref, *, dt, kt):
    # x_ref  : (tb, Dp) f32      initial augmented state block (resident over j)
    # w1_ref : (kt, Dp, Hp)      weights for this time block (streamed over j)
    # b1_ref : (T,  Hp)  f32     ALL step biases, resident in VMEM
    # w2_ref : (kt, Hp, Dp)
    # b2_ref : (T,  Dp)  f32
    # out_ref: (tb, Dp) f32      resident output block; holds the Euler carry
    j = pl.program_id(1)                    # time-block index

    @pl.when(j == 0)
    def _init():
        out_ref[...] = x_ref[...]

    def euler_step(i, state):
        k = j * kt + i                       # global time index (for biases)
        w1 = w1_ref[i]                       # (Dp, Hp)  bf16/f32 MXU operands
        w2 = w2_ref[i]                       # (Hp, Dp)
        mm = w1.dtype
        h = jnp.tanh(                         # bias add + tanh stay f32
            jnp.dot(state.astype(mm), w1, preferred_element_type=jnp.float32)
            + b1_ref[pl.ds(k, 1), :])
        f = (jnp.dot(h.astype(mm), w2, preferred_element_type=jnp.float32)
             + b2_ref[pl.ds(k, 1), :])
        return state + dt * f                # f32 Euler accumulate

    state = out_ref[...]
    if kt <= 32:
        # Fully unrolled: static weight indices, one long basic block for LLO.
        for i in range(kt):
            state = euler_step(i, state)
    else:
        state = jax.lax.fori_loop(0, kt, euler_step, state, unroll=8)
    out_ref[...] = state


# ----------------------------------------------------------------------------
# Wrapper mirroring Semiflow.forward(x, eval_times=None) -> state at t = T
# ----------------------------------------------------------------------------
def semiflow_forward(x, params, *, augment_dim, T, time_steps,
                     matmul_dtype=jnp.bfloat16):
    w1, b1, w2, b2 = params
    orig_shape = x.shape
    B = x.shape[0]

    # Glue matching the PyTorch forward: flatten + zero-augment the state.
    if augment_dim > 0:
        x_flat = x.reshape(B, -1)
        x_state = jnp.concatenate(
            [x_flat, jnp.zeros((B, augment_dim), x.dtype)], axis=1)
    else:
        x_state = x.reshape(B, -1)

    D = x_state.shape[1]
    H = w1.shape[-1]
    assert w1.shape == (time_steps, D, H)
    assert w2.shape == (time_steps, H, D)

    # Lane-dense padding: D, H -> multiples of 128.
    Dp = _round_up(D, 128)
    Hp = _round_up(H, 128)

    # Chip hints (wrapped so failure never breaks the kernel).
    try:
        kind = jax.devices()[0].device_kind.lower()
    except Exception:
        kind = ""
    is_v7 = "v7" in kind
    multi_tc = is_v7 or ("v5p" in kind) or ("v4" in kind)

    # Batch tiling: up to 256 rows/tile (fills the 256-wide MXU on v6e/v7x).
    tb = min(256, _round_up(B, 8))
    # On 2-TC chips make sure the 'parallel' batch axis has >= 2 tiles.
    if multi_tc and B >= 16 and _round_up(B, tb) // tb < 2:
        tb = max(8, _round_up((B + 1) // 2, 8))
    Bp = _round_up(B, tb)
    nb = Bp // tb

    # Padded operands.  Zero-padded weights/biases keep the padded state lanes
    # at exactly zero, so the valid lanes are bit-identical to the unpadded op.
    xp = jnp.zeros((Bp, Dp), jnp.float32).at[:B, :D].set(
        x_state.astype(jnp.float32))
    w1p = (jnp.zeros((time_steps, Dp, Hp), jnp.float32)
           .at[:, :D, :H].set(w1.astype(jnp.float32)).astype(matmul_dtype))
    w2p = (jnp.zeros((time_steps, Hp, Dp), jnp.float32)
           .at[:, :H, :D].set(w2.astype(jnp.float32)).astype(matmul_dtype))
    b1p = (jnp.zeros((time_steps, Hp), jnp.float32)
           .at[:, :H].set(b1.reshape(time_steps, H).astype(jnp.float32)))
    b2p = (jnp.zeros((time_steps, Dp), jnp.float32)
           .at[:, :D].set(b2.reshape(time_steps, D).astype(jnp.float32)))

    dt = float(T) / float(time_steps)
    w_bytes = jnp.dtype(matmul_dtype).itemsize

    # ---- Pick Kt (time-fusion depth) from the VMEM budget. -------------------
    per_step_w_bytes = (Dp * Hp + Hp * Dp) * w_bytes       # W1[k] + W2[k]
    bias_bytes = time_steps * (Hp + Dp) * 4                 # resident biases
    tile_bytes = tb * Dp * 4                                 # x / out tile (f32)

    def _vmem_needed(cand_kt):
        # double-buffered streamed weights + resident biases + x/out blocks
        return (2 * cand_kt * per_step_w_bytes
                + 2 * bias_bytes
                + 4 * tile_bytes)

    budget = (40 << 20) if is_v7 else (88 << 20)     # headroom on 64 MiB v7x
    kt = 1
    for cand in range(1, time_steps + 1):
        if time_steps % cand == 0 and _vmem_needed(cand) <= budget:
            kt = cand
    n_tblocks = time_steps // kt

    vmem_cap = (56 << 20) if is_v7 else (110 << 20)
    vmem_limit = int(min(max(_vmem_needed(kt) + (16 << 20), 32 << 20),
                         vmem_cap))

    kernel = functools.partial(semiflow_kernel, dt=dt, kt=kt)

    # Cost estimate (weights stream once total when fully fused/resident,
    # otherwise once per batch tile).
    weight_streams = 1 if kt == time_steps else nb
    flops = int(4 * Bp * Dp * Hp * time_steps)              # two matmuls/step
    transcendentals = int(Bp * Hp * time_steps)              # tanh
    bytes_accessed = int(
        weight_streams * (w1p.size + w2p.size) * w_bytes
        + (b1p.size + b2p.size) * 4
        + 2 * Bp * Dp * 4)

    out = pl.pallas_call(
        kernel,
        out_shape=jax.ShapeDtypeStruct((Bp, Dp), jnp.float32),
        grid_spec=pltpu.PrefetchScalarGridSpec(
            num_scalar_prefetch=0,
            grid=(nb, n_tblocks),                    # time blocks innermost (carry)
            in_specs=[
                pl.BlockSpec((tb, Dp), lambda b, j: (b, 0)),          # x0 (resident over j)
                pl.BlockSpec((kt, Dp, Hp), lambda b, j: (j, 0, 0)),   # W1 time block
                pl.BlockSpec((time_steps, Hp), lambda b, j: (0, 0)),  # all b1 (resident)
                pl.BlockSpec((kt, Hp, Dp), lambda b, j: (j, 0, 0)),   # W2 time block
                pl.BlockSpec((time_steps, Dp), lambda b, j: (0, 0)),  # all b2 (resident)
            ],
            out_specs=pl.BlockSpec((tb, Dp), lambda b, j: (b, 0)),
        ),
        compiler_params=pltpu.CompilerParams(
            dimension_semantics=("parallel", "arbitrary"),
            vmem_limit_bytes=vmem_limit,
        ),
        cost_estimate=pl.CostEstimate(
            flops=flops,
            transcendentals=transcendentals,
            bytes_accessed=bytes_accessed,
        ),
    )(xp, w1p, b1p, w2p, b2p)

    out = out[:B, :D].astype(x.dtype)
    if augment_dim == 0:
        out = out.reshape(orig_shape)
    return out
    # TODO(synk): adjoint=True (odeint_adjoint backward sensitivities) and
    # eval_times/trajectory multi-time outputs are not implemented (training /
    # diagnostics features with no forward-pass analogue here).


# ----------------------------------------------------------------------------
# Pure-JAX reference (same Euler scheme / same operand dtype) for checking
# ----------------------------------------------------------------------------
def semiflow_reference(x, params, *, augment_dim, T, time_steps,
                       matmul_dtype=jnp.float32):
    B = x.shape[0]
    orig_shape = x.shape
    if augment_dim > 0:
        x_flat = x.reshape(B, -1)
        state = jnp.concatenate(
            [x_flat, jnp.zeros((B, augment_dim), x.dtype)], axis=1)
    else:
        state = x.reshape(B, -1)
    state = state.astype(jnp.float32)
    w1, b1, w2, b2 = params
    dt = float(T) / float(time_steps)
    for k in range(time_steps):
        h = jnp.tanh(
            jnp.dot(state.astype(matmul_dtype), w1[k].astype(matmul_dtype),
                    preferred_element_type=jnp.float32)
            + b1[k].reshape(1, -1).astype(jnp.float32))
        f = (jnp.dot(h.astype(matmul_dtype), w2[k].astype(matmul_dtype),
                     preferred_element_type=jnp.float32)
             + b2[k].reshape(1, -1).astype(jnp.float32))
        state = state + dt * f
    out = state.astype(x.dtype)
    if augment_dim == 0:
        out = out.reshape(orig_shape)
    return out


if __name__ == "__main__":
    # Small, Semiflow-consistent shapes.
    B = 8                     # batch
    data_shape = (1, 4, 7)    # tiny image -> flattened data_dim = 28
    data_dim = 1 * 4 * 7
    augment_dim = 4
    D = data_dim + augment_dim    # ODE state dimension = 32
    H = 64                        # dynamics hidden width
    T = 10.0
    time_steps = 10

    key = jax.random.PRNGKey(0)
    k_x, k_w1, k_b1, k_w2, k_b2 = jax.random.split(key, 5)

    x = jax.random.normal(k_x, (B,) + data_shape, dtype=jnp.float32)
    w1 = jax.random.normal(k_w1, (time_steps, D, H), jnp.float32) / jnp.sqrt(D)
    b1 = 0.1 * jax.random.normal(k_b1, (time_steps, 1, H), jnp.float32)
    w2 = jax.random.normal(k_w2, (time_steps, H, D), jnp.float32) / jnp.sqrt(H)
    b2 = 0.1 * jax.random.normal(k_b2, (time_steps, 1, D), jnp.float32)
    params = (w1, b1, w2, b2)

    # bf16 MXU operands (new default on every generation), f32 accumulation and
    # f32 bias / tanh / Euler update.
    out_bf16 = jax.block_until_ready(
        semiflow_forward(x, params, augment_dim=augment_dim,
                         T=T, time_steps=time_steps))
    ref_bf16 = semiflow_reference(x, params, augment_dim=augment_dim,
                                  T=T, time_steps=time_steps,
                                  matmul_dtype=jnp.bfloat16)
    assert out_bf16.shape == (B, D)
    assert out_bf16.dtype == x.dtype
    assert jnp.allclose(out_bf16, ref_bf16, atol=2e-2, rtol=2e-2), \
        "bf16 kernel mismatch vs reference"

    # f32 MXU operands (opt-in exactness check).
    out_f32 = jax.block_until_ready(
        semiflow_forward(x, params, augment_dim=augment_dim,
                         T=T, time_steps=time_steps,
                         matmul_dtype=jnp.float32))
    ref_f32 = semiflow_reference(x, params, augment_dim=augment_dim,
                                 T=T, time_steps=time_steps,
                                 matmul_dtype=jnp.float32)
    assert jnp.allclose(out_f32, ref_f32, atol=1e-4, rtol=1e-4), \
        "f32 kernel mismatch vs reference"

    print("KERNEL_OK")
</pallas_src>

<mosaic_0001>
module attributes {stable_mosaic.version = 11 : i64} {
  func.func @semiflow_kernel(%arg0: i32, %arg1: i32, %arg2: memref<8x128xf32, #tpu.memory_space<vmem>>, %arg3: memref<10x128x128xbf16, #tpu.memory_space<vmem>>, %arg4: memref<10x128xf32, #tpu.memory_space<vmem>>, %arg5: memref<10x128x128xbf16, #tpu.memory_space<vmem>>, %arg6: memref<10x128xf32, #tpu.memory_space<vmem>>, %arg7: memref<8x128xf32, #tpu.memory_space<vmem>>) attributes {dimension_semantics = [#tpu.dimension_semantics<parallel>, #tpu.dimension_semantics<arbitrary>], iteration_bounds = array<i64: 1, 1>, scalar_prefetch = 0 : i64, scratch_operands = 0 : i64, tpu.core_type = #tpu.core_type<tc>, window_params = [{transform_indices = @transform_0, window_bounds = array<i64: 8, 128>}, {transform_indices = @transform_1, window_bounds = array<i64: 10, 128, 128>}, {pipeline_mode = #tpu.pipeline_mode<synchronous>, transform_indices = @transform_2, window_bounds = array<i64: 10, 128>}, {transform_indices = @transform_3, window_bounds = array<i64: 10, 128, 128>}, {pipeline_mode = #tpu.pipeline_mode<synchronous>, transform_indices = @transform_4, window_bounds = array<i64: 10, 128>}, {transform_indices = @transform_5, window_bounds = array<i64: 8, 128>}]} {
    %c0_i32 = arith.constant 0 : i32
    %0 = arith.cmpi eq, %arg1, %c0_i32 : i32
    %1 = arith.extui %0 : i1 to i32
    %c0_i32_0 = arith.constant 0 : i32
    %2 = arith.cmpi ne, %1, %c0_i32_0 : i32
    scf.if %2 {
      %c0_114 = arith.constant 0 : index
      %c0_115 = arith.constant 0 : index
      %225 = vector.load %arg2[%c0_114, %c0_115] : memref<8x128xf32, #tpu.memory_space<vmem>>, vector<8x128xf32>
      %c0_116 = arith.constant 0 : index
      %c0_117 = arith.constant 0 : index
      %226 = vector.load %arg7[%c0_116, %c0_117] : memref<8x128xf32, #tpu.memory_space<vmem>>, vector<8x128xf32>
      tpu.vector_store %arg7[%c0_116, %c0_117], %225 {strides = array<i32>} : memref<8x128xf32, #tpu.memory_space<vmem>>, vector<8x128xf32>,
    } else {
    }
    %c0 = arith.constant 0 : index
    %c0_1 = arith.constant 0 : index
    %3 = vector.load %arg7[%c0, %c0_1] : memref<8x128xf32, #tpu.memory_space<vmem>>, vector<8x128xf32>
    %c10_i32 = arith.constant 10 : i32
    %4 = arith.muli %arg1, %c10_i32 : i32
    %c0_i32_2 = arith.constant 0 : i32
    %5 = arith.addi %4, %c0_i32_2 : i32
    %c0_3 = arith.constant 0 : index
    %c0_4 = arith.constant 0 : index
    %c0_5 = arith.constant 0 : index
    %6 = vector.load %arg3[%c0_3, %c0_4, %c0_5] : memref<10x128x128xbf16, #tpu.memory_space<vmem>>, vector<1x128x128xbf16>
    %7 = vector.shape_cast %6 : vector<1x128x128xbf16> to vector<128x128xbf16>
    %c0_6 = arith.constant 0 : index
    %c0_7 = arith.constant 0 : index
    %c0_8 = arith.constant 0 : index
    %8 = vector.load %arg5[%c0_6, %c0_7, %c0_8] : memref<10x128x128xbf16, #tpu.memory_space<vmem>>, vector<1x128x128xbf16>
    %9 = vector.shape_cast %8 : vector<1x128x128xbf16> to vector<128x128xbf16>
    %10 = arith.truncf %3 : vector<8x128xf32> to vector<8x128xbf16>
    %cst = arith.constant dense<0.000000e+00> : vector<8x128xf32>
    %11 = tpu.matmul %10, %7, %cst {dimension_numbers = #tpu.dot_dimension_numbers<[1], [0], [0], [1], [0, 0, 1, 1], [], []>} : vector<8x128xbf16>, vector<128x128xbf16>, vector<8x128xf32> -> vector<8x128xf32>
    %12 = arith.index_cast %5 : i32 to index
    %c0_9 = arith.constant 0 : index
    %13 = vector.load %arg4[%12, %c0_9] : memref<10x128xf32, #tpu.memory_space<vmem>>, vector<1x128xf32>
    %14 = vector.broadcast %13 : vector<1x128xf32> to vector<8x128xf32>
    %15 = arith.addf %11, %14 : vector<8x128xf32>
    %16 = math.tanh %15 : vector<8x128xf32>
    %17 = arith.truncf %16 : vector<8x128xf32> to vector<8x128xbf16>
    %cst_10 = arith.constant dense<0.000000e+00> : vector<8x128xf32>
    %18 = tpu.matmul %17, %9, %cst_10 {dimension_numbers = #tpu.dot_dimension_numbers<[1], [0], [0], [1], [0, 0, 1, 1], [], []>} : vector<8x128xbf16>, vector<128x128xbf16>, vector<8x128xf32> -> vector<8x128xf32>
    %19 = arith.index_cast %5 : i32 to index
    %c0_11 = arith.constant 0 : index
    %20 = vector.load %arg6[%19, %c0_11] : memref<10x128xf32, #tpu.memory_space<vmem>>, vector<1x128xf32>
    %21 = vector.broadcast %20 : vector<1x128xf32> to vector<8x128xf32>
    %22 = arith.addf %18, %21 : vector<8x128xf32>
    %cst_12 = arith.constant 1.000000e+00 : f32
    %23 = vector.broadcast %cst_12 : f32 to vector<8x128xf32>
    %24 = arith.mulf %23, %22 : vector<8x128xf32>
    %25 = arith.addf %3, %24 : vector<8x128xf32>
    %c10_i32_13 = arith.constant 10 : i32
    %26 = arith.muli %arg1, %c10_i32_13 : i32
    %c1_i32 = arith.constant 1 : i32
    %27 = arith.addi %26, %c1_i32 : i32
    %c1 = arith.constant 1 : index
    %c0_14 = arith.constant 0 : index
    %c0_15 = arith.constant 0 : index
    %28 = vector.load %arg3[%c1, %c0_14, %c0_15] : memref<10x128x128xbf16, #tpu.memory_space<vmem>>, vector<1x128x128xbf16>
    %29 = vector.shape_cast %28 : vector<1x128x128xbf16> to vector<128x128xbf16>
    %c1_16 = arith.constant 1 : index
    %c0_17 = arith.constant 0 : index
    %c0_18 = arith.constant 0 : index
    %30 = vector.load %arg5[%c1_16, %c0_17, %c0_18] : memref<10x128x128xbf16, #tpu.memory_space<vmem>>, vector<1x128x128xbf16>
    %31 = vector.shape_cast %30 : vector<1x128x128xbf16> to vector<128x128xbf16>
    %32 = arith.truncf %25 : vector<8x128xf32> to vector<8x128xbf16>
    %cst_19 = arith.constant dense<0.000000e+00> : vector<8x128xf32>
    %33 = tpu.matmul %32, %29, %cst_19 {dimension_numbers = #tpu.dot_dimension_numbers<[1], [0], [0], [1], [0, 0, 1, 1], [], []>} : vector<8x128xbf16>, vector<128x128xbf16>, vector<8x128xf32> -> vector<8x128xf32>
    %34 = arith.index_cast %27 : i32 to index
    %c0_20 = arith.constant 0 : index
    %35 = vector.load %arg4[%34, %c0_20] : memref<10x128xf32, #tpu.memory_space<vmem>>, vector<1x128xf32>
    %36 = vector.broadcast %35 : vector<1x128xf32> to vector<8x128xf32>
    %37 = arith.addf %33, %36 : vector<8x128xf32>
    %38 = math.tanh %37 : vector<8x128xf32>
    %39 = arith.truncf %38 : vector<8x128xf32> to vector<8x128xbf16>
    %cst_21 = arith.constant dense<0.000000e+00> : vector<8x128xf32>
    %40 = tpu.matmul %39, %31, %cst_21 {dimension_numbers = #tpu.dot_dimension_numbers<[1], [0], [0], [1], [0, 0, 1, 1], [], []>} : vector<8x128xbf16>, vector<128x128xbf16>, vector<8x128xf32> -> vector<8x128xf32>
    %41 = arith.index_cast %27 : i32 to index
    %c0_22 = arith.constant 0 : index
    %42 = vector.load %arg6[%41, %c0_22] : memref<10x128xf32, #tpu.memory_space<vmem>>, vector<1x128xf32>
    %43 = vector.broadcast %42 : vector<1x128xf32> to vector<8x128xf32>
    %44 = arith.addf %40, %43 : vector<8x128xf32>
    %cst_23 = arith.constant 1.000000e+00 : f32
    %45 = vector.broadcast %cst_23 : f32 to vector<8x128xf32>
    %46 = arith.mulf %45, %44 : vector<8x128xf32>
    %47 = arith.addf %25, %46 : vector<8x128xf32>
    %c10_i32_24 = arith.constant 10 : i32
    %48 = arith.muli %arg1, %c10_i32_24 : i32
    %c2_i32 = arith.constant 2 : i32
    %49 = arith.addi %48, %c2_i32 : i32
    %c2 = arith.constant 2 : index
    %c0_25 = arith.constant 0 : index
    %c0_26 = arith.constant 0 : index
    %50 = vector.load %arg3[%c2, %c0_25, %c0_26] : memref<10x128x128xbf16, #tpu.memory_space<vmem>>, vector<1x128x128xbf16>
    %51 = vector.shape_cast %50 : vector<1x128x128xbf16> to vector<128x128xbf16>
    %c2_27 = arith.constant 2 : index
    %c0_28 = arith.constant 0 : index
    %c0_29 = arith.constant 0 : index
    %52 = vector.load %arg5[%c2_27, %c0_28, %c0_29] : memref<10x128x128xbf16, #tpu.memory_space<vmem>>, vector<1x128x128xbf16>
    %53 = vector.shape_cast %52 : vector<1x128x128xbf16> to vector<128x128xbf16>
    %54 = arith.truncf %47 : vector<8x128xf32> to vector<8x128xbf16>
    %cst_30 = arith.constant dense<0.000000e+00> : vector<8x128xf32>
    %55 = tpu.matmul %54, %51, %cst_30 {dimension_numbers = #tpu.dot_dimension_numbers<[1], [0], [0], [1], [0, 0, 1, 1], [], []>} : vector<8x128xbf16>, vector<128x128xbf16>, vector<8x128xf32> -> vector<8x128xf32>
    %56 = arith.index_cast %49 : i32 to index
    %c0_31 = arith.constant 0 : index
    %57 = vector.load %arg4[%56, %c0_31] : memref<10x128xf32, #tpu.memory_space<vmem>>, vector<1x128xf32>
    %58 = vector.broadcast %57 : vector<1x128xf32> to vector<8x128xf32>
    %59 = arith.addf %55, %58 : vector<8x128xf32>
    %60 = math.tanh %59 : vector<8x128xf32>
    %61 = arith.truncf %60 : vector<8x128xf32> to vector<8x128xbf16>
    %cst_32 = arith.constant dense<0.000000e+00> : vector<8x128xf32>
    %62 = tpu.matmul %61, %53, %cst_32 {dimension_numbers = #tpu.dot_dimension_numbers<[1], [0], [0], [1], [0, 0, 1, 1], [], []>} : vector<8x128xbf16>, vector<128x128xbf16>, vector<8x128xf32> -> vector<8x128xf32>
    %63 = arith.index_cast %49 : i32 to index
    %c0_33 = arith.constant 0 : index
    %64 = vector.load %arg6[%63, %c0_33] : memref<10x128xf32, #tpu.memory_space<vmem>>, vector<1x128xf32>
    %65 = vector.broadcast %64 : vector<1x128xf32> to vector<8x128xf32>
    %66 = arith.addf %62, %65 : vector<8x128xf32>
    %cst_34 = arith.constant 1.000000e+00 : f32
    %67 = vector.broadcast %cst_34 : f32 to vector<8x128xf32>
    %68 = arith.mulf %67, %66 : vector<8x128xf32>
    %69 = arith.addf %47, %68 : vector<8x128xf32>
    %c10_i32_35 = arith.constant 10 : i32
    %70 = arith.muli %arg1, %c10_i32_35 : i32
    %c3_i32 = arith.constant 3 : i32
    %71 = arith.addi %70, %c3_i32 : i32
    %c3 = arith.constant 3 : index
    %c0_36 = arith.constant 0 : index
    %c0_37 = arith.constant 0 : index
    %72 = vector.load %arg3[%c3, %c0_36, %c0_37] : memref<10x128x128xbf16, #tpu.memory_space<vmem>>, vector<1x128x128xbf16>
    %73 = vector.shape_cast %72 : vector<1x128x128xbf16> to vector<128x128xbf16>
    %c3_38 = arith.constant 3 : index
    %c0_39 = arith.constant 0 : index
    %c0_40 = arith.constant 0 : index
    %74 = vector.load %arg5[%c3_38, %c0_39, %c0_40] : memref<10x128x128xbf16, #tpu.memory_space<vmem>>, vector<1x128x128xbf16>
    %75 = vector.shape_cast %74 : vector<1x128x128xbf16> to vector<128x128xbf16>
    %76 = arith.truncf %69 : vector<8x128xf32> to vector<8x128xbf16>
    %cst_41 = arith.constant dense<0.000000e+00> : vector<8x128xf32>
    %77 = tpu.matmul %76, %73, %cst_41 {dimension_numbers = #tpu.dot_dimension_numbers<[1], [0], [0], [1], [0, 0, 1, 1], [], []>} : vector<8x128xbf16>, vector<128x128xbf16>, vector<8x128xf32> -> vector<8x128xf32>
    %78 = arith.index_cast %71 : i32 to index
    %c0_42 = arith.constant 0 : index
    %79 = vector.load %arg4[%78, %c0_42] : memref<10x128xf32, #tpu.memory_space<vmem>>, vector<1x128xf32>
    %80 = vector.broadcast %79 : vector<1x128xf32> to vector<8x128xf32>
    %81 = arith.addf %77, %80 : vector<8x128xf32>
    %82 = math.tanh %81 : vector<8x128xf32>
    %83 = arith.truncf %82 : vector<8x128xf32> to vector<8x128xbf16>
    %cst_43 = arith.constant dense<0.000000e+00> : vector<8x128xf32>
    %84 = tpu.matmul %83, %75, %cst_43 {dimension_numbers = #tpu.dot_dimension_numbers<[1], [0], [0], [1], [0, 0, 1, 1], [], []>} : vector<8x128xbf16>, vector<128x128xbf16>, vector<8x128xf32> -> vector<8x128xf32>
    %85 = arith.index_cast %71 : i32 to index
    %c0_44 = arith.constant 0 : index
    %86 = vector.load %arg6[%85, %c0_44] : memref<10x128xf32, #tpu.memory_space<vmem>>, vector<1x128xf32>
    %87 = vector.broadcast %86 : vector<1x128xf32> to vector<8x128xf32>
    %88 = arith.addf %84, %87 : vector<8x128xf32>
    %cst_45 = arith.constant 1.000000e+00 : f32
    %89 = vector.broadcast %cst_45 : f32 to vector<8x128xf32>
    %90 = arith.mulf %89, %88 : vector<8x128xf32>
    %91 = arith.addf %69, %90 : vector<8x128xf32>
    %c10_i32_46 = arith.constant 10 : i32
    %92 = arith.muli %arg1, %c10_i32_46 : i32
    %c4_i32 = arith.constant 4 : i32
    %93 = arith.addi %92, %c4_i32 : i32
    %c4 = arith.constant 4 : index
    %c0_47 = arith.constant 0 : index
    %c0_48 = arith.constant 0 : index
    %94 = vector.load %arg3[%c4, %c0_47, %c0_48] : memref<10x128x128xbf16, #tpu.memory_space<vmem>>, vector<1x128x128xbf16>
    %95 = vector.shape_cast %94 : vector<1x128x128xbf16> to vector<128x128xbf16>
    %c4_49 = arith.constant 4 : index
    %c0_50 = arith.constant 0 : index
    %c0_51 = arith.constant 0 : index
    %96 = vector.load %arg5[%c4_49, %c0_50, %c0_51] : memref<10x128x128xbf16, #tpu.memory_space<vmem>>, vector<1x128x128xbf16>
    %97 = vector.shape_cast %96 : vector<1x128x128xbf16> to vector<128x128xbf16>
    %98 = arith.truncf %91 : vector<8x128xf32> to vector<8x128xbf16>
    %cst_52 = arith.constant dense<0.000000e+00> : vector<8x128xf32>
    %99 = tpu.matmul %98, %95, %cst_52 {dimension_numbers = #tpu.dot_dimension_numbers<[1], [0], [0], [1], [0, 0, 1, 1], [], []>} : vector<8x128xbf16>, vector<128x128xbf16>, vector<8x128xf32> -> vector<8x128xf32>
    %100 = arith.index_cast %93 : i32 to index
    %c0_53 = arith.constant 0 : index
    %101 = vector.load %arg4[%100, %c0_53] : memref<10x128xf32, #tpu.memory_space<vmem>>, vector<1x128xf32>
    %102 = vector.broadcast %101 : vector<1x128xf32> to vector<8x128xf32>
    %103 = arith.addf %99, %102 : vector<8x128xf32>
    %104 = math.tanh %103 : vector<8x128xf32>
    %105 = arith.truncf %104 : vector<8x128xf32> to vector<8x128xbf16>
    %cst_54 = arith.constant dense<0.000000e+00> : vector<8x128xf32>
    %106 = tpu.matmul %105, %97, %cst_54 {dimension_numbers = #tpu.dot_dimension_numbers<[1], [0], [0], [1], [0, 0, 1, 1], [], []>} : vector<8x128xbf16>, vector<128x128xbf16>, vector<8x128xf32> -> vector<8x128xf32>
    %107 = arith.index_cast %93 : i32 to index
    %c0_55 = arith.constant 0 : index
    %108 = vector.load %arg6[%107, %c0_55] : memref<10x128xf32, #tpu.memory_space<vmem>>, vector<1x128xf32>
    %109 = vector.broadcast %108 : vector<1x128xf32> to vector<8x128xf32>
    %110 = arith.addf %106, %109 : vector<8x128xf32>
    %cst_56 = arith.constant 1.000000e+00 : f32
    %111 = vector.broadcast %cst_56 : f32 to vector<8x128xf32>
    %112 = arith.mulf %111, %110 : vector<8x128xf32>
    %113 = arith.addf %91, %112 : vector<8x128xf32>
    %c10_i32_57 = arith.constant 10 : i32
    %114 = arith.muli %arg1, %c10_i32_57 : i32
    %c5_i32 = arith.constant 5 : i32
    %115 = arith.addi %114, %c5_i32 : i32
    %c5 = arith.constant 5 : index
    %c0_58 = arith.constant 0 : index
    %c0_59 = arith.constant 0 : index
    %116 = vector.load %arg3[%c5, %c0_58, %c0_59] : memref<10x128x128xbf16, #tpu.memory_space<vmem>>, vector<1x128x128xbf16>
    %117 = vector.shape_cast %116 : vector<1x128x128xbf16> to vector<128x128xbf16>
    %c5_60 = arith.constant 5 : index
    %c0_61 = arith.constant 0 : index
    %c0_62 = arith.constant 0 : index
    %118 = vector.load %arg5[%c5_60, %c0_61, %c0_62] : memref<10x128x128xbf16, #tpu.memory_space<vmem>>, vector<1x128x128xbf16>
    %119 = vector.shape_cast %118 : vector<1x128x128xbf16> to vector<128x128xbf16>
    %120 = arith.truncf %113 : vector<8x128xf32> to vector<8x128xbf16>
    %cst_63 = arith.constant dense<0.000000e+00> : vector<8x128xf32>
    %121 = tpu.matmul %120, %117, %cst_63 {dimension_numbers = #tpu.dot_dimension_numbers<[1], [0], [0], [1], [0, 0, 1, 1], [], []>} : vector<8x128xbf16>, vector<128x128xbf16>, vector<8x128xf32> -> vector<8x128xf32>
    %122 = arith.index_cast %115 : i32 to index
    %c0_64 = arith.constant 0 : index
    %123 = vector.load %arg4[%122, %c0_64] : memref<10x128xf32, #tpu.memory_space<vmem>>, vector<1x128xf32>
    %124 = vector.broadcast %123 : vector<1x128xf32> to vector<8x128xf32>
    %125 = arith.addf %121, %124 : vector<8x128xf32>
    %126 = math.tanh %125 : vector<8x128xf32>
    %127 = arith.truncf %126 : vector<8x128xf32> to vector<8x128xbf16>
    %cst_65 = arith.constant dense<0.000000e+00> : vector<8x128xf32>
    %128 = tpu.matmul %127, %119, %cst_65 {dimension_numbers = #tpu.dot_dimension_numbers<[1], [0], [0], [1], [0, 0, 1, 1], [], []>} : vector<8x128xbf16>, vector<128x128xbf16>, vector<8x128xf32> -> vector<8x128xf32>
    %129 = arith.index_cast %115 : i32 to index
    %c0_66 = arith.constant 0 : index
    %130 = vector.load %arg6[%129, %c0_66] : memref<10x128xf32, #tpu.memory_space<vmem>>, vector<1x128xf32>
    %131 = vector.broadcast %130 : vector<1x128xf32> to vector<8x128xf32>
    %132 = arith.addf %128, %131 : vector<8x128xf32>
    %cst_67 = arith.constant 1.000000e+00 : f32
    %133 = vector.broadcast %cst_67 : f32 to vector<8x128xf32>
    %134 = arith.mulf %133, %132 : vector<8x128xf32>
    %135 = arith.addf %113, %134 : vector<8x128xf32>
    %c10_i32_68 = arith.constant 10 : i32
    %136 = arith.muli %arg1, %c10_i32_68 : i32
    %c6_i32 = arith.constant 6 : i32
    %137 = arith.addi %136, %c6_i32 : i32
    %c6 = arith.constant 6 : index
    %c0_69 = arith.constant 0 : index
    %c0_70 = arith.constant 0 : index
    %138 = vector.load %arg3[%c6, %c0_69, %c0_70] : memref<10x128x128xbf16, #tpu.memory_space<vmem>>, vector<1x128x128xbf16>
    %139 = vector.shape_cast %138 : vector<1x128x128xbf16> to vector<128x128xbf16>
    %c6_71 = arith.constant 6 : index
    %c0_72 = arith.constant 0 : index
    %c0_73 = arith.constant 0 : index
    %140 = vector.load %arg5[%c6_71, %c0_72, %c0_73] : memref<10x128x128xbf16, #tpu.memory_space<vmem>>, vector<1x128x128xbf16>
    %141 = vector.shape_cast %140 : vector<1x128x128xbf16> to vector<128x128xbf16>
    %142 = arith.truncf %135 : vector<8x128xf32> to vector<8x128xbf16>
    %cst_74 = arith.constant dense<0.000000e+00> : vector<8x128xf32>
    %143 = tpu.matmul %142, %139, %cst_74 {dimension_numbers = #tpu.dot_dimension_numbers<[1], [0], [0], [1], [0, 0, 1, 1], [], []>} : vector<8x128xbf16>, vector<128x128xbf16>, vector<8x128xf32> -> vector<8x128xf32>
    %144 = arith.index_cast %137 : i32 to index
    %c0_75 = arith.constant 0 : index
    %145 = vector.load %arg4[%144, %c0_75] : memref<10x128xf32, #tpu.memory_space<vmem>>, vector<1x128xf32>
    %146 = vector.broadcast %145 : vector<1x128xf32> to vector<8x128xf32>
    %147 = arith.addf %143, %146 : vector<8x128xf32>
    %148 = math.tanh %147 : vector<8x128xf32>
    %149 = arith.truncf %148 : vector<8x128xf32> to vector<8x128xbf16>
    %cst_76 = arith.constant dense<0.000000e+00> : vector<8x128xf32>
    %150 = tpu.matmul %149, %141, %cst_76 {dimension_numbers = #tpu.dot_dimension_numbers<[1], [0], [0], [1], [0, 0, 1, 1], [], []>} : vector<8x128xbf16>, vector<128x128xbf16>, vector<8x128xf32> -> vector<8x128xf32>
    %151 = arith.index_cast %137 : i32 to index
    %c0_77 = arith.constant 0 : index
    %152 = vector.load %arg6[%151, %c0_77] : memref<10x128xf32, #tpu.memory_space<vmem>>, vector<1x128xf32>
    %153 = vector.broadcast %152 : vector<1x128xf32> to vector<8x128xf32>
    %154 = arith.addf %150, %153 : vector<8x128xf32>
    %cst_78 = arith.constant 1.000000e+00 : f32
    %155 = vector.broadcast %cst_78 : f32 to vector<8x128xf32>
    %156 = arith.mulf %155, %154 : vector<8x128xf32>
    %157 = arith.addf %135, %156 : vector<8x128xf32>
    %c10_i32_79 = arith.constant 10 : i32
    %158 = arith.muli %arg1, %c10_i32_79 : i32
    %c7_i32 = arith.constant 7 : i32
    %159 = arith.addi %158, %c7_i32 : i32
    %c7 = arith.constant 7 : index
    %c0_80 = arith.constant 0 : index
    %c0_81 = arith.constant 0 : index
    %160 = vector.load %arg3[%c7, %c0_80, %c0_81] : memref<10x128x128xbf16, #tpu.memory_space<vmem>>, vector<1x128x128xbf16>
    %161 = vector.shape_cast %160 : vector<1x128x128xbf16> to vector<128x128xbf16>
    %c7_82 = arith.constant 7 : index
    %c0_83 = arith.constant 0 : index
    %c0_84 = arith.constant 0 : index
    %162 = vector.load %arg5[%c7_82, %c0_83, %c0_84] : memref<10x128x128xbf16, #tpu.memory_space<vmem>>, vector<1x128x128xbf16>
    %163 = vector.shape_cast %162 : vector<1x128x128xbf16> to vector<128x128xbf16>
    %164 = arith.truncf %157 : vector<8x128xf32> to vector<8x128xbf16>
    %cst_85 = arith.constant dense<0.000000e+00> : vector<8x128xf32>
    %165 = tpu.matmul %164, %161, %cst_85 {dimension_numbers = #tpu.dot_dimension_numbers<[1], [0], [0], [1], [0, 0, 1, 1], [], []>} : vector<8x128xbf16>, vector<128x128xbf16>, vector<8x128xf32> -> vector<8x128xf32>
    %166 = arith.index_cast %159 : i32 to index
    %c0_86 = arith.constant 0 : index
    %167 = vector.load %arg4[%166, %c0_86] : memref<10x128xf32, #tpu.memory_space<vmem>>, vector<1x128xf32>
    %168 = vector.broadcast %167 : vector<1x128xf32> to vector<8x128xf32>
    %169 = arith.addf %165, %168 : vector<8x128xf32>
    %170 = math.tanh %169 : vector<8x128xf32>
    %171 = arith.truncf %170 : vector<8x128xf32> to vector<8x128xbf16>
    %cst_87 = arith.constant dense<0.000000e+00> : vector<8x128xf32>
    %172 = tpu.matmul %171, %163, %cst_87 {dimension_numbers = #tpu.dot_dimension_numbers<[1], [0], [0], [1], [0, 0, 1, 1], [], []>} : vector<8x128xbf16>, vector<128x128xbf16>, vector<8x128xf32> -> vector<8x128xf32>
    %173 = arith.index_cast %159 : i32 to index
    %c0_88 = arith.constant 0 : index
    %174 = vector.load %arg6[%173, %c0_88] : memref<10x128xf32, #tpu.memory_space<vmem>>, vector<1x128xf32>
    %175 = vector.broadcast %174 : vector<1x128xf32> to vector<8x128xf32>
    %176 = arith.addf %172, %175 : vector<8x128xf32>
    %cst_89 = arith.constant 1.000000e+00 : f32
    %177 = vector.broadcast %cst_89 : f32 to vector<8x128xf32>
    %178 = arith.mulf %177, %176 : vector<8x128xf32>
    %179 = arith.addf %157, %178 : vector<8x128xf32>
    %c10_i32_90 = arith.constant 10 : i32
    %180 = arith.muli %arg1, %c10_i32_90 : i32
    %c8_i32 = arith.constant 8 : i32
    %181 = arith.addi %180, %c8_i32 : i32
    %c8 = arith.constant 8 : index
    %c0_91 = arith.constant 0 : index
    %c0_92 = arith.constant 0 : index
    %182 = vector.load %arg3[%c8, %c0_91, %c0_92] : memref<10x128x128xbf16, #tpu.memory_space<vmem>>, vector<1x128x128xbf16>
    %183 = vector.shape_cast %182 : vector<1x128x128xbf16> to vector<128x128xbf16>
    %c8_93 = arith.constant 8 : index
    %c0_94 = arith.constant 0 : index
    %c0_95 = arith.constant 0 : index
    %184 = vector.load %arg5[%c8_93, %c0_94, %c0_95] : memref<10x128x128xbf16, #tpu.memory_space<vmem>>, vector<1x128x128xbf16>
    %185 = vector.shape_cast %184 : vector<1x128x128xbf16> to vector<128x128xbf16>
    %186 = arith.truncf %179 : vector<8x128xf32> to vector<8x128xbf16>
    %cst_96 = arith.constant dense<0.000000e+00> : vector<8x128xf32>
    %187 = tpu.matmul %186, %183, %cst_96 {dimension_numbers = #tpu.dot_dimension_numbers<[1], [0], [0], [1], [0, 0, 1, 1], [], []>} : vector<8x128xbf16>, vector<128x128xbf16>, vector<8x128xf32> -> vector<8x128xf32>
    %188 = arith.index_cast %181 : i32 to index
    %c0_97 = arith.constant 0 : index
    %189 = vector.load %arg4[%188, %c0_97] : memref<10x128xf32, #tpu.memory_space<vmem>>, vector<1x128xf32>
    %190 = vector.broadcast %189 : vector<1x128xf32> to vector<8x128xf32>
    %191 = arith.addf %187, %190 : vector<8x128xf32>
    %192 = math.tanh %191 : vector<8x128xf32>
    %193 = arith.truncf %192 : vector<8x128xf32> to vector<8x128xbf16>
    %cst_98 = arith.constant dense<0.000000e+00> : vector<8x128xf32>
    %194 = tpu.matmul %193, %185, %cst_98 {dimension_numbers = #tpu.dot_dimension_numbers<[1], [0], [0], [1], [0, 0, 1, 1], [], []>} : vector<8x128xbf16>, vector<128x128xbf16>, vector<8x128xf32> -> vector<8x128xf32>
    %195 = arith.index_cast %181 : i32 to index
    %c0_99 = arith.constant 0 : index
    %196 = vector.load %arg6[%195, %c0_99] : memref<10x128xf32, #tpu.memory_space<vmem>>, vector<1x128xf32>
    %197 = vector.broadcast %196 : vector<1x128xf32> to vector<8x128xf32>
    %198 = arith.addf %194, %197 : vector<8x128xf32>
    %cst_100 = arith.constant 1.000000e+00 : f32
    %199 = vector.broadcast %cst_100 : f32 to vector<8x128xf32>
    %200 = arith.mulf %199, %198 : vector<8x128xf32>
    %201 = arith.addf %179, %200 : vector<8x128xf32>
    %c10_i32_101 = arith.constant 10 : i32
    %202 = arith.muli %arg1, %c10_i32_101 : i32
    %c9_i32 = arith.constant 9 : i32
    %203 = arith.addi %202, %c9_i32 : i32
    %c9 = arith.constant 9 : index
    %c0_102 = arith.constant 0 : index
    %c0_103 = arith.constant 0 : index
    %204 = vector.load %arg3[%c9, %c0_102, %c0_103] : memref<10x128x128xbf16, #tpu.memory_space<vmem>>, vector<1x128x128xbf16>
    %205 = vector.shape_cast %204 : vector<1x128x128xbf16> to vector<128x128xbf16>
    %c9_104 = arith.constant 9 : index
    %c0_105 = arith.constant 0 : index
    %c0_106 = arith.constant 0 : index
    %206 = vector.load %arg5[%c9_104, %c0_105, %c0_106] : memref<10x128x128xbf16, #tpu.memory_space<vmem>>, vector<1x128x128xbf16>
    %207 = vector.shape_cast %206 : vector<1x128x128xbf16> to vector<128x128xbf16>
    %208 = arith.truncf %201 : vector<8x128xf32> to vector<8x128xbf16>
    %cst_107 = arith.constant dense<0.000000e+00> : vector<8x128xf32>
    %209 = tpu.matmul %208, %205, %cst_107 {dimension_numbers = #tpu.dot_dimension_numbers<[1], [0], [0], [1], [0, 0, 1, 1], [], []>} : vector<8x128xbf16>, vector<128x128xbf16>, vector<8x128xf32> -> vector<8x128xf32>
    %210 = arith.index_cast %203 : i32 to index
    %c0_108 = arith.constant 0 : index
    %211 = vector.load %arg4[%210, %c0_108] : memref<10x128xf32, #tpu.memory_space<vmem>>, vector<1x128xf32>
    %212 = vector.broadcast %211 : vector<1x128xf32> to vector<8x128xf32>
    %213 = arith.addf %209, %212 : vector<8x128xf32>
    %214 = math.tanh %213 : vector<8x128xf32>
    %215 = arith.truncf %214 : vector<8x128xf32> to vector<8x128xbf16>
    %cst_109 = arith.constant dense<0.000000e+00> : vector<8x128xf32>
    %216 = tpu.matmul %215, %207, %cst_109 {dimension_numbers = #tpu.dot_dimension_numbers<[1], [0], [0], [1], [0, 0, 1, 1], [], []>} : vector<8x128xbf16>, vector<128x128xbf16>, vector<8x128xf32> -> vector<8x128xf32>
    %217 = arith.index_cast %203 : i32 to index
    %c0_110 = arith.constant 0 : index
    %218 = vector.load %arg6[%217, %c0_110] : memref<10x128xf32, #tpu.memory_space<vmem>>, vector<1x128xf32>
    %219 = vector.broadcast %218 : vector<1x128xf32> to vector<8x128xf32>
    %220 = arith.addf %216, %219 : vector<8x128xf32>
    %cst_111 = arith.constant 1.000000e+00 : f32
    %221 = vector.broadcast %cst_111 : f32 to vector<8x128xf32>
    %222 = arith.mulf %221, %220 : vector<8x128xf32>
    %223 = arith.addf %201, %222 : vector<8x128xf32>
    %c0_112 = arith.constant 0 : index
    %c0_113 = arith.constant 0 : index
    %224 = vector.load %arg7[%c0_112, %c0_113] : memref<8x128xf32, #tpu.memory_space<vmem>>, vector<8x128xf32>
    tpu.vector_store %arg7[%c0_112, %c0_113], %223 {strides = array<i32>} : memref<8x128xf32, #tpu.memory_space<vmem>>, vector<8x128xf32>,
    return
  }
  func.func @transform_0(%arg0: i32, %arg1: i32) -> (i32, i32) {
    %c0_i32 = arith.constant 0 : i32
    %c0_i32_0 = arith.constant 0 : i32
    return %arg0, %c0_i32 : i32, i32
  }
  func.func @transform_1(%arg0: i32, %arg1: i32) -> (i32, i32, i32) {
    %c0_i32 = arith.constant 0 : i32
    %c0_i32_0 = arith.constant 0 : i32
    %c0_i32_1 = arith.constant 0 : i32
    return %arg1, %c0_i32, %c0_i32_0 : i32, i32, i32
  }
  func.func @transform_2(%arg0: i32, %arg1: i32) -> (i32, i32) {
    %c0_i32 = arith.constant 0 : i32
    %c0_i32_0 = arith.constant 0 : i32
    %c0_i32_1 = arith.constant 0 : i32
    return %c0_i32, %c0_i32_0 : i32, i32
  }
  func.func @transform_3(%arg0: i32, %arg1: i32) -> (i32, i32, i32) {
    %c0_i32 = arith.constant 0 : i32
    %c0_i32_0 = arith.constant 0 : i32
    %c0_i32_1 = arith.constant 0 : i32
    return %arg1, %c0_i32, %c0_i32_0 : i32, i32, i32
  }
  func.func @transform_4(%arg0: i32, %arg1: i32) -> (i32, i32) {
    %c0_i32 = arith.constant 0 : i32
    %c0_i32_0 = arith.constant 0 : i32
    %c0_i32_1 = arith.constant 0 : i32
    return %c0_i32, %c0_i32_0 : i32, i32
  }
  func.func @transform_5(%arg0: i32, %arg1: i32) -> (i32, i32) {
    %c0_i32 = arith.constant 0 : i32
    %c0_i32_0 = arith.constant 0 : i32
    return %arg0, %c0_i32 : i32, i32
  }
}

</mosaic_0001>

<bundles_post_ra>
// kernel: tpu_custom_call.1
= control target key start
LH: loop header
LB: loop body
LE: loop exit
PB: predicated region body
PF: predicated region fallthrough
CT: control target
= control target key end

     0   :  { %10 = vsyncpa [#allocation3], 0  ;;  %s2870_s0 = inlined_call_operand.hbm [shape: f32[8,128], index: 0, kind: input, shape index: {}]   ;;  %s2871_s1 = inlined_call_operand.hbm [shape: bf16[10,128,128], index: 1, kind: input, shape index: {}]   ;;  %s2872_s2 = inlined_call_operand.hbm [shape: f32[10,128], index: 2, kind: input, shape index: {}]   ;;  %s2873_s3 = inlined_call_operand.hbm [shape: bf16[10,128,128], index: 3, kind: input, shape index: {}]   ;;  %s2874_s4 = inlined_call_operand.hbm [shape: f32[10,128], index: 4, kind: input, shape index: {}]   ;;  %s2875_s5 = inlined_call_operand.hbm [shape: f32[8,128], index: 5, kind: output, shape index: {}]  }
   0x1   :  { %11 = vsyncpa [#allocation6], 0 }
   0x2   :  { %12 = vsyncpa [#allocation9], 0  ;;  %s29_s20 = sshll.u32 %s2871_s1, 4  ;;  %s30_s20 = int_to_ptr.hbm [resolvable:$true] %s29_s20 }
   0x3   :  { %13 = vsyncpa [#allocation4], 0  ;;  %s2812_s21 = smov [#allocation5]   ;;  %s55_s25 = sshll.u32 %s2873_s3, 4  ;;  %s56_s25 = int_to_ptr.hbm [resolvable:$true] %s55_s25 }
   0x4   :  { %s31_s22 = sshll.u32 %s2812_s21, 4  ;;  %s2813_s26 = smov 64   ;;  %s32_s22 = int_to_ptr.vmem [resolvable:$true] %s31_s22 }
   0x5   :  { %s2814_s27 = smov 4   ;;  %s2815_s28 = smov [#allocation8]  }
   0x6   :  { %37 = dma.hbm_to_vmem [thread:$0]  %s30_s20, 10240, %s32_s22, [#allocation6], %s2813_s26, %s2813_s26, %s2814_s27  }
   0x7   :  { %s57_s29 = sshll.u32 %s2815_s28, 4  ;;  %s19_s7 = sshll.u32 %s2870_s0, 4  ;;  %s58_s29 = int_to_ptr.vmem [resolvable:$true] %s57_s29  ;;  %s20_s7 = int_to_ptr.hbm [resolvable:$true] %s19_s7 }
   0x8   :  { %63 = dma.hbm_to_vmem [thread:$0]  %s56_s25, 10240, %s58_s29, [#allocation9], %s2813_s26, %s2813_s26, %s2814_s27  }
   0x9   :  { %s42_s9 = sshll.u32 %s2872_s2, 4  ;;  %s2816_s10 = smov [#allocation2]   ;;  %s43_s9 = int_to_ptr.hbm [resolvable:$true] %s42_s9 }
   0xa   :  { %s21_s11 = sshll.u32 %s2816_s10, 4  ;;  %s2817_s3 = smov [#allocation7]   ;;  %s22_s11 = int_to_ptr.vmem [resolvable:$true] %s21_s11 }
   0xb   :  { %24 = dma.hbm_to_vmem [thread:$0]  %s20_s7, 128, %s22_s11, [#allocation3]  }
   0xc   :  { %s44_s12 = sshll.u32 %s2817_s3, 4  ;;  %s2818_s13 = smov 128   ;;  %s45_s12 = int_to_ptr.vmem [resolvable:$true] %s44_s12 }
   0xd   :  { %s2819_s14 = smov 8   ;;  %s68_s16 = sshll.u32 %s2874_s4, 4  ;;  %s69_s16 = int_to_ptr.hbm [resolvable:$true] %s68_s16 }
   0xe   :  { %50 = dma.hbm_to_vmem [thread:$0]  %s43_s9, 256, %s45_s12, [#allocation6], %s2818_s13, %s2818_s13, %s2819_s14  }
   0xf   :  { %s2820_s17 = smov [#allocation10]  }
  0x10   :  { %s70_s18 = sshll.u32 %s2820_s17, 4  ;;  %s71_s18 = int_to_ptr.vmem [resolvable:$true] %s70_s18 }
  0x11   :  { %76 = dma.hbm_to_vmem [thread:$0]  %s69_s16, 256, %s71_s18, [#allocation9], %s2818_s13, %s2818_s13, %s2819_s14  }
  0x12   :  { %2804 = dma.done.wait [#allocation3], 128  }
  0x13   :  { %2805 = vsyncadd [#allocation3], 4294967168 }
  0x14   :  { %2806 = dma.done.wait [#allocation6], 10496  }
  0x15   :  { %2807 = vsyncadd [#allocation6], 4294956800 }
  0x16   :  { %2808 = dma.done.wait [#allocation9], 10496  }
  0x17   :  { %2809 = vsyncadd [#allocation9], 4294956800  ;;  %v2457_v0 = vld [vmem:[#allocation5 + $0x38] sm:$0xff]  ;;  %v2456_v1 = vld [vmem:[#allocation5 + $0x30] sm:$0xff]  ;;  %s2821_s2 = smov [#allocation11]   ;;  %s1780_s21 = sshll.u32 %s2875_s5, 4  ;;  %s1781_s21 = int_to_ptr.hbm [resolvable:$true] %s1780_s21 }
  0x18   :  { %189 = vmatpush.bf16.msra.mxu0 %v2457_v0  ;;  %v2465_v2 = vld [vmem:[#allocation8 + $0x38] sm:$0xff]  ;;  %v2464_v4 = vld [vmem:[#allocation8 + $0x30] sm:$0xff]  ;;  %v2463_v5 = vld [vmem:[#allocation8 + $0x28] sm:$0xff]  ;;  %s1778_s4 = sshll.u32 %s2821_s2, 4  ;;  %s1779_s4 = int_to_ptr.vmem [resolvable:$true] %s1778_s4 }
  0x19   :  { %v2455_v3 = vld [vmem:[#allocation5 + $0x28] sm:$0xff]  ;;  %255 = vmatpush.bf16.msra.mxu1 %v2465_v2  ;;  %v2454_v6 = vld [vmem:[#allocation5 + $0x20] sm:$0xff]  ;;  %v2462_v7 = vld [vmem:[#allocation8 + $0x20] sm:$0xff] }
  0x1a   :  { %v2453_v8 = vld [vmem:[#allocation5 + $0x18] sm:$0xff]  ;;  %v2461_v9 = vld [vmem:[#allocation8 + $0x18] sm:$0xff]  ;;  %v2452_v10 = vld [vmem:[#allocation5 + $0x10] sm:$0xff] }
  0x1b   :  { %v2451_v11 = vld [vmem:[#allocation5 + $0x8] sm:$0xff]  ;;  %v2450_v12 = vld [vmem:[#allocation5] sm:$0xff]  ;;  %v101_v13 = vld [vmem:[#allocation2] sm:$0xff] }
  0x1c   :  { %190 = vmatpush.bf16.msra.mxu0 %v2456_v1  ;;  %v137_v14 = vpack.c.bf16 %v101_v13, %v101_v13  ;;  %v2460_v15 = vld [vmem:[#allocation8 + $0x10] sm:$0xff]  ;;  %v2459_v16 = vld [vmem:[#allocation8 + $0x8] sm:$0xff]  ;;  %v2458_v17 = vld [vmem:[#allocation8] sm:$0xff] }
  0x1d   :  { %256 = vmatpush.bf16.msra.mxu1 %v2464_v4  ;;  %v2473_v18 = vld [vmem:[#allocation5 + $0x78] sm:$0xff]  ;;  %v2472_v19 = vld [vmem:[#allocation5 + $0x70] sm:$0xff]  ;;  %v2471_v20 = vld [vmem:[#allocation5 + $0x68] sm:$0xff] }
  0x1e   :  { %356 = vmatpush.bf16.msra.mxu2 %v2473_v18  ;;  %v2470_v21 = vld [vmem:[#allocation5 + $0x60] sm:$0xff]  ;;  %v2469_v22 = vld [vmem:[#allocation5 + $0x58] sm:$0xff]  ;;  %v2468_v24 = vld [vmem:[#allocation5 + $0x50] sm:$0xff] }
  0x1f   :  { %v2620_v23 = vld [vmem:[#allocation7] ss:$0 sm:$0xff]  ;;  %v2467_v30 = vld [vmem:[#allocation5 + $0x48] sm:$0xff]  ;;  %v2479_v34 = vld [vmem:[#allocation8 + $0x68] sm:$0xff] }
  0x20   :  { %191 = vmatpush.bf16.msra.mxu0 %v2455_v3  ;;  %v2466_v31 = vld [vmem:[#allocation5 + $0x40] sm:$0xff]  ;;  %v2481_v32 = vld [vmem:[#allocation8 + $0x78] sm:$0xff]  ;;  %v2478_v35 = vld [vmem:[#allocation8 + $0x60] sm:$0xff] }
  0x21   :  { %257 = vmatpush.bf16.msra.mxu1 %v2463_v5  ;;  %422 = vmatpush.bf16.msra.mxu3 %v2481_v32  ;;  %v2480_v33 = vld [vmem:[#allocation8 + $0x70] sm:$0xff]  ;;  %v2477_v36 = vld [vmem:[#allocation8 + $0x58] sm:$0xff]  ;;  %v2621_v37 = vld [vmem:[#allocation10] ss:$0 sm:$0xff] }
  0x22   :  { %357 = vmatpush.bf16.msra.mxu2 %v2472_v19  ;;  %v2476_v43 = vld [vmem:[#allocation8 + $0x50] sm:$0xff]  ;;  %v2475_v44 = vld [vmem:[#allocation8 + $0x48] sm:$0xff]  ;;  %v2474_v45 = vld [vmem:[#allocation8 + $0x40] sm:$0xff] }
  0x23   :  { %v2489_v46 = vld [vmem:[#allocation5 + $0xb8] sm:$0xff]  ;;  %v2488_v47 = vld [vmem:[#allocation5 + $0xb0] sm:$0xff]  ;;  %v2487_v48 = vld [vmem:[#allocation5 + $0xa8] sm:$0xff] }
  0x24   :  { %192 = vmatpush.bf16.msra.mxu0 %v2454_v6  ;;  %v2486_v49 = vld [vmem:[#allocation5 + $0xa0] sm:$0xff]  ;;  %v2485_v50 = vld [vmem:[#allocation5 + $0x98] sm:$0xff]  ;;  %v2484_v52 = vld [vmem:[#allocation5 + $0x90] sm:$0xff] }
  0x25   :  { %258 = vmatpush.bf16.msra.mxu1 %v2462_v7  ;;  %423 = vmatpush.bf16.msra.mxu3 %v2480_v33  ;;  %v2622_v51 = vld [vmem:[#allocation7 + $0x1] ss:$0 sm:$0xff]  ;;  %v2483_v58 = vld [vmem:[#allocation5 + $0x88] sm:$0xff]  ;;  %v2495_v62 = vld [vmem:[#allocation8 + $0xa8] sm:$0xff] }
  0x26   :  { %358 = vmatpush.bf16.msra.mxu2 %v2471_v20  ;;  %v2482_v59 = vld [vmem:[#allocation5 + $0x80] sm:$0xff]  ;;  %v2497_v60 = vld [vmem:[#allocation8 + $0xb8] sm:$0xff]  ;;  %v2494_v63 = vld [vmem:[#allocation8 + $0xa0] sm:$0xff] }
  0x27   :  { %v2496_v61 = vld [vmem:[#allocation8 + $0xb0] sm:$0xff]  ;;  %v2493_v0 = vld [vmem:[#allocation8 + $0x98] sm:$0xff]  ;;  %v2623_v1 = vld [vmem:[#allocation10 + $0x1] ss:$0 sm:$0xff] }
  0x28   :  { %193 = vmatpush.bf16.msra.mxu0 %v2453_v8  ;;  %v2492_v7 = vld [vmem:[#allocation8 + $0x90] sm:$0xff]  ;;  %v2491_v8 = vld [vmem:[#allocation8 + $0x88] sm:$0xff] }
  0x29   :  { %259 = vmatpush.bf16.msra.mxu1 %v2461_v9  ;;  %424 = vmatpush.bf16.msra.mxu3 %v2479_v34  ;;  %v2490_v9 = vld [vmem:[#allocation8 + $0x80] sm:$0xff] }
  0x2a   :  { %359 = vmatpush.bf16.msra.mxu2 %v2470_v21 }
  0x2c   :  { %194 = vmatpush.bf16.msra.mxu0 %v2452_v10  ;;  %v2505_v10 = vld [vmem:[#allocation5 + $0xf8] sm:$0xff] }
  0x2d   :  { %260 = vmatpush.bf16.msra.mxu1 %v2460_v15  ;;  %425 = vmatpush.bf16.msra.mxu3 %v2478_v35  ;;  %v2624_v15 = vld [vmem:[#allocation7 + $0x2] ss:$0 sm:$0xff] }
  0x2e   :  { %360 = vmatpush.bf16.msra.mxu2 %v2469_v22  ;;  %v2499_v22 = vld [vmem:[#allocation5 + $0xc8] sm:$0xff]  ;;  %v2508_v35 = vld [vmem:[#allocation8 + $0xd0] sm:$0xff] }
  0x30   :  { %195 = vmatpush.bf16.msra.mxu0 %v2451_v11  ;;  %v2504_v11 = vld [vmem:[#allocation5 + $0xf0] sm:$0xff] }
  0x31   :  { %261 = vmatpush.bf16.msra.mxu1 %v2459_v16  ;;  %426 = vmatpush.bf16.msra.mxu3 %v2477_v36  ;;  %v2500_v16 = vld [vmem:[#allocation5 + $0xd0] sm:$0xff]  ;;  %v2507_v36 = vld [vmem:[#allocation8 + $0xc8] sm:$0xff] }
  0x32   :  { %361 = vmatpush.bf16.msra.mxu2 %v2468_v24  ;;  %v2513_v24 = vld [vmem:[#allocation8 + $0xf8] sm:$0xff] }
  0x34   :  { %196 = vmatpush.bf16.msra.mxu0 %v2450_v12  ;;  %v2503_v12 = vld [vmem:[#allocation5 + $0xe8] sm:$0xff] }
  0x35   :  { %262 = vmatpush.bf16.msra.mxu1 %v2458_v17  ;;  %427 = vmatpush.bf16.msra.mxu3 %v2476_v43  ;;  %v2626_v43 = vld [vmem:[#allocation7 + $0x3] ss:$0 sm:$0xff] }
  0x36   :  { %362 = vmatpush.bf16.msra.mxu2 %v2467_v30 }
  0x37   :  { %197 = vmatmul.bf16.vlgmr.msra.gmra.mxu0 %v137_v14  ;;  %v2501_v14 = vld [vmem:[#allocation5 + $0xd8] sm:$0xff] }
  0x38   :  { %523 = vmatpush.bf16.msrb.mxu0 %v2489_v46 }
  0x39   :  { %428 = vmatpush.bf16.msra.mxu3 %v2475_v44  ;;  %589 = vmatpush.bf16.msrb.mxu1 %v2497_v60  ;;  %v2516_v44 = vld [vmem:[#allocation5 + $0x110] sm:$0xff] }
  0x3a   :  { %363 = vmatpush.bf16.msra.mxu2 %v2466_v31 }
  0x3c   :  { %524 = vmatpush.bf16.msrb.mxu0 %v2488_v47 }
  0x3d   :  { %429 = vmatpush.bf16.msra.mxu3 %v2474_v45  ;;  %590 = vmatpush.bf16.msrb.mxu1 %v2496_v61 }
  0x3e   :  { %690 = vmatpush.bf16.msrb.mxu2 %v2505_v10 }
  0x40   :  { %525 = vmatpush.bf16.msrb.mxu0 %v2487_v48 }
  0x41   :  { %591 = vmatpush.bf16.msrb.mxu1 %v2495_v62  ;;  %756 = vmatpush.bf16.msrb.mxu3 %v2513_v24 }
  0x42   :  { %691 = vmatpush.bf16.msrb.mxu2 %v2504_v11 }
  0x44   :  { %526 = vmatpush.bf16.msrb.mxu0 %v2486_v49 }
  0x45   :  { %592 = vmatpush.bf16.msrb.mxu1 %v2494_v63  ;;  %v2524_v63 = vld [vmem:[#allocation8 + $0x110] sm:$0xff] }
  0x46   :  { %692 = vmatpush.bf16.msrb.mxu2 %v2503_v12 }
  0x48   :  { %527 = vmatpush.bf16.msrb.mxu0 %v2485_v50  ;;  %v2515_v50 = vld [vmem:[#allocation5 + $0x108] sm:$0xff] }
  0x49   :  { %593 = vmatpush.bf16.msrb.mxu1 %v2493_v0  ;;  %v2523_v0 = vld [vmem:[#allocation8 + $0x108] sm:$0xff] }
  0x4c   :  { %528 = vmatpush.bf16.msrb.mxu0 %v2484_v52  ;;  %v2529_v52 = vld [vmem:[#allocation8 + $0x138] sm:$0xff] }
  0x4d   :  { %594 = vmatpush.bf16.msrb.mxu1 %v2492_v7  ;;  %v2628_v7 = vld [vmem:[#allocation7 + $0x4] ss:$0 sm:$0xff] }
  0x50   :  { %529 = vmatpush.bf16.msrb.mxu0 %v2483_v58 }
  0x51   :  { %595 = vmatpush.bf16.msrb.mxu1 %v2491_v8  ;;  %v2532_v8 = vld [vmem:[#allocation5 + $0x150] sm:$0xff] }
  0x54   :  { %530 = vmatpush.bf16.msrb.mxu0 %v2482_v59 }
  0x55   :  { %596 = vmatpush.bf16.msrb.mxu1 %v2490_v9 }
  0xb4   :  { %v198_v25 = vpop.f32.mrf.mxu0 }
  0xb5   :  { %v199_v26 = vadd.f32 %v2620_v23, %v198_v25  ;;  %v2498_v23 = vld [vmem:[#allocation5 + $0xc0] sm:$0xff] }
  0xb6   :  { %v2512_v25 = vld [vmem:[#allocation8 + $0xf0] sm:$0xff] }
  0xb7   :  { %2640 = vtanh.f32 %v199_v26  ;;  %757 = vmatpush.bf16.msrb.mxu3 %v2512_v25  ;;  %v2511_v26 = vld [vmem:[#allocation8 + $0xe8] sm:$0xff] }
  0xbb   :  { %758 = vmatpush.bf16.msrb.mxu3 %v2511_v26 }
  0xbc   :  { %v200_v27 = vpop.f32.mrf.mxu0 }
  0xbd   :  { %v2641_v28 = vpop.eup %2640  ;;  %v2510_v27 = vld [vmem:[#allocation8 + $0xe0] sm:$0xff] }
  0xbe   :  { %v203_v29 = vpack.c.bf16 %v2641_v28, %v2641_v28  ;;  %v2509_v28 = vld [vmem:[#allocation8 + $0xd8] sm:$0xff] }
  0xbf   :  { %759 = vmatpush.bf16.msrb.mxu3 %v2510_v27  ;;  %v2540_v27 = vld [vmem:[#allocation8 + $0x150] sm:$0xff] }
  0xc0   :  { %263 = vmatmul.bf16.vlgmr.msra.gmra.mxu1 %v203_v29  ;;  %v2625_v29 = vld [vmem:[#allocation10 + $0x2] ss:$0 sm:$0xff] }
  0xc1   :  { %923 = vmatpush.bf16.msra.mxu1 %v2529_v52 }
  0xc3   :  { %760 = vmatpush.bf16.msrb.mxu3 %v2509_v28  ;;  %v2539_v28 = vld [vmem:[#allocation8 + $0x148] sm:$0xff] }
  0xc7   :  { %761 = vmatpush.bf16.msrb.mxu3 %v2508_v35  ;;  %v2630_v35 = vld [vmem:[#allocation7 + $0x5] ss:$0 sm:$0xff] }
  0xcb   :  { %762 = vmatpush.bf16.msrb.mxu3 %v2507_v36  ;;  %v2548_v36 = vld [vmem:[#allocation5 + $0x190] sm:$0xff] }
 0x13d   :  { %v264_v38 = vpop.f32.mrf.mxu1 }
 0x13e   :  { %v265_v39 = vadd.f32 %v2621_v37, %v264_v38  ;;  %v2506_v37 = vld [vmem:[#allocation8 + $0xc0] sm:$0xff]  ;;  %v2521_v38 = vld [vmem:[#allocation5 + $0x138] sm:$0xff] }
 0x13f   :  { %763 = vmatpush.bf16.msrb.mxu3 %v2506_v37  ;;  %857 = vmatpush.bf16.msra.mxu0 %v2521_v38 }
 0x140   :  { %v268_v40 = vadd.f32 %v265_v39, %v101_v13  ;;  %v2502_v13 = vld [vmem:[#allocation5 + $0xe0] sm:$0xff]  ;;  %v2520_v39 = vld [vmem:[#allocation5 + $0x130] sm:$0xff] }
 0x141   :  { %693 = vmatpush.bf16.msrb.mxu2 %v2502_v13 }
 0x142   :  { %v304_v41 = vpack.c.bf16 %v268_v40, %v268_v40 }
 0x143   :  { %858 = vmatpush.bf16.msra.mxu0 %v2520_v39 }
 0x144   :  { %364 = vmatmul.bf16.vlgmr.msra.gmra.mxu2 %v304_v41  ;;  %v2518_v41 = vld [vmem:[#allocation5 + $0x120] sm:$0xff] }
 0x145   :  { %v266_v42 = vpop.f32.mrf.mxu1  ;;  %694 = vmatpush.bf16.msrb.mxu2 %v2501_v14  ;;  %v2531_v14 = vld [vmem:[#allocation5 + $0x148] sm:$0xff] }
 0x146   :  { %v2517_v42 = vld [vmem:[#allocation5 + $0x118] sm:$0xff] }
 0x149   :  { %695 = vmatpush.bf16.msrb.mxu2 %v2500_v16  ;;  %v2545_v16 = vld [vmem:[#allocation8 + $0x178] sm:$0xff] }
 0x14d   :  { %696 = vmatpush.bf16.msrb.mxu2 %v2499_v22 }
 0x151   :  { %697 = vmatpush.bf16.msrb.mxu2 %v2498_v23 }
 0x1c7   :  { %v365_v53 = vpop.f32.mrf.mxu2 }
 0x1c8   :  { %v366_v54 = vadd.f32 %v2622_v51, %v365_v53  ;;  %v2514_v51 = vld [vmem:[#allocation5 + $0x100] sm:$0xff] }
 0x1c9   :  { %v2528_v53 = vld [vmem:[#allocation8 + $0x130] sm:$0xff] }
 0x1ca   :  { %2642 = vtanh.f32 %v366_v54  ;;  %924 = vmatpush.bf16.msra.mxu1 %v2528_v53  ;;  %v2527_v54 = vld [vmem:[#allocation8 + $0x128] sm:$0xff] }
 0x1ce   :  { %925 = vmatpush.bf16.msra.mxu1 %v2527_v54 }
 0x1cf   :  { %v367_v55 = vpop.f32.mrf.mxu2 }
 0x1d0   :  { %v2643_v56 = vpop.eup %2642  ;;  %v2526_v55 = vld [vmem:[#allocation8 + $0x120] sm:$0xff] }
 0x1d1   :  { %v370_v57 = vpack.c.bf16 %v2643_v56, %v2643_v56  ;;  %v2525_v56 = vld [vmem:[#allocation8 + $0x118] sm:$0xff] }
 0x1d2   :  { %926 = vmatpush.bf16.msra.mxu1 %v2526_v55  ;;  %v2556_v55 = vld [vmem:[#allocation8 + $0x190] sm:$0xff] }
 0x1d3   :  { %430 = vmatmul.bf16.vlgmr.msra.gmra.mxu3 %v370_v57  ;;  %v2627_v57 = vld [vmem:[#allocation10 + $0x3] ss:$0 sm:$0xff] }
 0x1d4   :  { %1090 = vmatpush.bf16.msra.mxu3 %v2545_v16 }
 0x1d6   :  { %927 = vmatpush.bf16.msra.mxu1 %v2525_v56  ;;  %v2555_v56 = vld [vmem:[#allocation8 + $0x188] sm:$0xff] }
 0x1da   :  { %928 = vmatpush.bf16.msra.mxu1 %v2524_v63  ;;  %v2632_v63 = vld [vmem:[#allocation7 + $0x6] ss:$0 sm:$0xff] }
 0x1de   :  { %929 = vmatpush.bf16.msra.mxu1 %v2523_v0  ;;  %v2564_v0 = vld [vmem:[#allocation5 + $0x1d0] sm:$0xff] }
 0x256   :  { %v431_v2 = vpop.f32.mrf.mxu3 }
 0x257   :  { %v432_v3 = vadd.f32 %v2623_v1, %v431_v2  ;;  %v2522_v1 = vld [vmem:[#allocation8 + $0x100] sm:$0xff]  ;;  %v2537_v2 = vld [vmem:[#allocation5 + $0x178] sm:$0xff] }
 0x258   :  { %930 = vmatpush.bf16.msra.mxu1 %v2522_v1  ;;  %1024 = vmatpush.bf16.msra.mxu2 %v2537_v2 }
 0x259   :  { %v435_v4 = vadd.f32 %v432_v3, %v268_v40  ;;  %v2519_v40 = vld [vmem:[#allocation5 + $0x128] sm:$0xff]  ;;  %v2536_v3 = vld [vmem:[#allocation5 + $0x170] sm:$0xff] }
 0x25a   :  { %859 = vmatpush.bf16.msra.mxu0 %v2519_v40 }
 0x25b   :  { %v471_v5 = vpack.c.bf16 %v435_v4, %v435_v4 }
 0x25c   :  { %1025 = vmatpush.bf16.msra.mxu2 %v2536_v3 }
 0x25d   :  { %531 = vmatmul.bf16.vlgmr.msrb.gmra.mxu0 %v471_v5  ;;  %v2534_v5 = vld [vmem:[#allocation5 + $0x160] sm:$0xff] }
 0x25e   :  { %v433_v6 = vpop.f32.mrf.mxu3  ;;  %860 = vmatpush.bf16.msra.mxu0 %v2518_v41 }
 0x25f   :  { %v2533_v6 = vld [vmem:[#allocation5 + $0x158] sm:$0xff] }
 0x262   :  { %861 = vmatpush.bf16.msra.mxu0 %v2517_v42  ;;  %v2547_v42 = vld [vmem:[#allocation5 + $0x188] sm:$0xff] }
 0x266   :  { %862 = vmatpush.bf16.msra.mxu0 %v2516_v44  ;;  %v2561_v44 = vld [vmem:[#allocation8 + $0x1b8] sm:$0xff] }
 0x26a   :  { %863 = vmatpush.bf16.msra.mxu0 %v2515_v50 }
 0x26e   :  { %864 = vmatpush.bf16.msra.mxu0 %v2514_v51 }
 0x2da   :  { %v532_v17 = vpop.f32.mrf.mxu0 }
 0x2db   :  { %v533_v18 = vadd.f32 %v2624_v15, %v532_v17  ;;  %v2530_v15 = vld [vmem:[#allocation5 + $0x140] sm:$0xff] }
 0x2dc   :  { %v2544_v17 = vld [vmem:[#allocation8 + $0x170] sm:$0xff] }
 0x2dd   :  { %2644 = vtanh.f32 %v533_v18  ;;  %1091 = vmatpush.bf16.msra.mxu3 %v2544_v17  ;;  %v2543_v18 = vld [vmem:[#allocation8 + $0x168] sm:$0xff] }
 0x2e1   :  { %1092 = vmatpush.bf16.msra.mxu3 %v2543_v18 }
 0x2e2   :  { %v534_v19 = vpop.f32.mrf.mxu0 }
 0x2e3   :  { %v2645_v20 = vpop.eup %2644  ;;  %v2542_v19 = vld [vmem:[#allocation8 + $0x160] sm:$0xff] }
 0x2e4   :  { %v537_v21 = vpack.c.bf16 %v2645_v20, %v2645_v20  ;;  %v2541_v20 = vld [vmem:[#allocation8 + $0x158] sm:$0xff] }
 0x2e5   :  { %1093 = vmatpush.bf16.msra.mxu3 %v2542_v19  ;;  %v2572_v19 = vld [vmem:[#allocation8 + $0x1d0] sm:$0xff] }
 0x2e6   :  { %597 = vmatmul.bf16.vlgmr.msrb.gmra.mxu1 %v537_v21  ;;  %v2629_v21 = vld [vmem:[#allocation10 + $0x4] ss:$0 sm:$0xff] }
 0x2e7   :  { %1257 = vmatpush.bf16.msrb.mxu1 %v2561_v44 }
 0x2e9   :  { %1094 = vmatpush.bf16.msra.mxu3 %v2541_v20  ;;  %v2571_v20 = vld [vmem:[#allocation8 + $0x1c8] sm:$0xff] }
 0x2ed   :  { %1095 = vmatpush.bf16.msra.mxu3 %v2540_v27  ;;  %v2634_v27 = vld [vmem:[#allocation7 + $0x7] ss:$0 sm:$0xff] }
 0x2f1   :  { %1096 = vmatpush.bf16.msra.mxu3 %v2539_v28  ;;  %v2580_v28 = vld [vmem:[#allocation5 + $0x210] sm:$0xff] }
 0x363   :  { %v598_v30 = vpop.f32.mrf.mxu1 }
 0x364   :  { %v599_v31 = vadd.f32 %v2625_v29, %v598_v30  ;;  %v2538_v29 = vld [vmem:[#allocation8 + $0x140] sm:$0xff]  ;;  %v2553_v30 = vld [vmem:[#allocation5 + $0x1b8] sm:$0xff] }
 0x365   :  { %1097 = vmatpush.bf16.msra.mxu3 %v2538_v29  ;;  %1191 = vmatpush.bf16.msrb.mxu0 %v2553_v30 }
 0x366   :  { %v602_v32 = vadd.f32 %v599_v31, %v435_v4  ;;  %v2535_v4 = vld [vmem:[#allocation5 + $0x168] sm:$0xff]  ;;  %v2552_v31 = vld [vmem:[#allocation5 + $0x1b0] sm:$0xff] }
 0x367   :  { %1026 = vmatpush.bf16.msra.mxu2 %v2535_v4 }
 0x368   :  { %v638_v33 = vpack.c.bf16 %v602_v32, %v602_v32 }
 0x369   :  { %1192 = vmatpush.bf16.msrb.mxu0 %v2552_v31 }
 0x36a   :  { %698 = vmatmul.bf16.vlgmr.msrb.gmra.mxu2 %v638_v33  ;;  %v2550_v33 = vld [vmem:[#allocation5 + $0x1a0] sm:$0xff] }
 0x36b   :  { %v600_v34 = vpop.f32.mrf.mxu1  ;;  %1027 = vmatpush.bf16.msra.mxu2 %v2534_v5 }
 0x36c   :  { %v2549_v34 = vld [vmem:[#allocation5 + $0x198] sm:$0xff] }
 0x36f   :  { %1028 = vmatpush.bf16.msra.mxu2 %v2533_v6  ;;  %v2563_v6 = vld [vmem:[#allocation5 + $0x1c8] sm:$0xff] }
 0x373   :  { %1029 = vmatpush.bf16.msra.mxu2 %v2532_v8  ;;  %v2577_v8 = vld [vmem:[#allocation8 + $0x1f8] sm:$0xff] }
 0x377   :  { %1030 = vmatpush.bf16.msra.mxu2 %v2531_v14 }
 0x37b   :  { %1031 = vmatpush.bf16.msra.mxu2 %v2530_v15 }
 0x3ed   :  { %v699_v45 = vpop.f32.mrf.mxu2 }
 0x3ee   :  { %v700_v46 = vadd.f32 %v2626_v43, %v699_v45  ;;  %v2546_v43 = vld [vmem:[#allocation5 + $0x180] sm:$0xff] }
 0x3ef   :  { %v2560_v45 = vld [vmem:[#allocation8 + $0x1b0] sm:$0xff] }
 0x3f0   :  { %2646 = vtanh.f32 %v700_v46  ;;  %1258 = vmatpush.bf16.msrb.mxu1 %v2560_v45  ;;  %v2559_v46 = vld [vmem:[#allocation8 + $0x1a8] sm:$0xff] }
 0x3f4   :  { %1259 = vmatpush.bf16.msrb.mxu1 %v2559_v46 }
 0x3f5   :  { %v701_v47 = vpop.f32.mrf.mxu2 }
 0x3f6   :  { %v2647_v48 = vpop.eup %2646  ;;  %v2558_v47 = vld [vmem:[#allocation8 + $0x1a0] sm:$0xff] }
 0x3f7   :  { %v704_v49 = vpack.c.bf16 %v2647_v48, %v2647_v48  ;;  %v2557_v48 = vld [vmem:[#allocation8 + $0x198] sm:$0xff] }
 0x3f8   :  { %1260 = vmatpush.bf16.msrb.mxu1 %v2558_v47  ;;  %v2588_v47 = vld [vmem:[#allocation8 + $0x210] sm:$0xff] }
 0x3f9   :  { %764 = vmatmul.bf16.vlgmr.msrb.gmra.mxu3 %v704_v49  ;;  %v2631_v49 = vld [vmem:[#allocation10 + $0x5] ss:$0 sm:$0xff] }
 0x3fa   :  { %1424 = vmatpush.bf16.msrb.mxu3 %v2577_v8 }
 0x3fc   :  { %1261 = vmatpush.bf16.msrb.mxu1 %v2557_v48  ;;  %v2587_v48 = vld [vmem:[#allocation8 + $0x208] sm:$0xff] }
 0x400   :  { %1262 = vmatpush.bf16.msrb.mxu1 %v2556_v55  ;;  %v2636_v55 = vld [vmem:[#allocation7 + $0x8] ss:$0 sm:$0xff] }
 0x404   :  { %1263 = vmatpush.bf16.msrb.mxu1 %v2555_v56  ;;  %v2596_v56 = vld [vmem:[#allocation5 + $0x250] sm:$0xff] }
 0x47c   :  { %v765_v58 = vpop.f32.mrf.mxu3 }
 0x47d   :  { %v766_v59 = vadd.f32 %v2627_v57, %v765_v58  ;;  %v2554_v57 = vld [vmem:[#allocation8 + $0x180] sm:$0xff]  ;;  %v2569_v58 = vld [vmem:[#allocation5 + $0x1f8] sm:$0xff] }
 0x47e   :  { %1264 = vmatpush.bf16.msrb.mxu1 %v2554_v57  ;;  %1358 = vmatpush.bf16.msrb.mxu2 %v2569_v58 }
 0x47f   :  { %v769_v60 = vadd.f32 %v766_v59, %v602_v32  ;;  %v2551_v32 = vld [vmem:[#allocation5 + $0x1a8] sm:$0xff]  ;;  %v2568_v59 = vld [vmem:[#allocation5 + $0x1f0] sm:$0xff] }
 0x480   :  { %1193 = vmatpush.bf16.msrb.mxu0 %v2551_v32 }
 0x481   :  { %v805_v61 = vpack.c.bf16 %v769_v60, %v769_v60 }
 0x482   :  { %1359 = vmatpush.bf16.msrb.mxu2 %v2568_v59 }
 0x483   :  { %865 = vmatmul.bf16.vlgmr.msra.gmra.mxu0 %v805_v61  ;;  %v2566_v61 = vld [vmem:[#allocation5 + $0x1e0] sm:$0xff] }
 0x484   :  { %v767_v62 = vpop.f32.mrf.mxu3  ;;  %1194 = vmatpush.bf16.msrb.mxu0 %v2550_v33 }
 0x485   :  { %v2565_v62 = vld [vmem:[#allocation5 + $0x1d8] sm:$0xff] }
 0x488   :  { %1195 = vmatpush.bf16.msrb.mxu0 %v2549_v34  ;;  %v2579_v34 = vld [vmem:[#allocation5 + $0x208] sm:$0xff] }
 0x48c   :  { %1196 = vmatpush.bf16.msrb.mxu0 %v2548_v36  ;;  %v2593_v36 = vld [vmem:[#allocation8 + $0x238] sm:$0xff] }
 0x490   :  { %1197 = vmatpush.bf16.msrb.mxu0 %v2547_v42 }
 0x494   :  { %1198 = vmatpush.bf16.msrb.mxu0 %v2546_v43 }
 0x500   :  { %v866_v9 = vpop.f32.mrf.mxu0 }
 0x501   :  { %v867_v10 = vadd.f32 %v2628_v7, %v866_v9  ;;  %v2562_v7 = vld [vmem:[#allocation5 + $0x1c0] sm:$0xff] }
 0x502   :  { %v2576_v9 = vld [vmem:[#allocation8 + $0x1f0] sm:$0xff] }
 0x503   :  { %2648 = vtanh.f32 %v867_v10  ;;  %1425 = vmatpush.bf16.msrb.mxu3 %v2576_v9  ;;  %v2575_v10 = vld [vmem:[#allocation8 + $0x1e8] sm:$0xff] }
 0x507   :  { %1426 = vmatpush.bf16.msrb.mxu3 %v2575_v10 }
 0x508   :  { %v868_v11 = vpop.f32.mrf.mxu0 }
 0x509   :  { %v2649_v12 = vpop.eup %2648  ;;  %v2574_v11 = vld [vmem:[#allocation8 + $0x1e0] sm:$0xff] }
 0x50a   :  { %v871_v13 = vpack.c.bf16 %v2649_v12, %v2649_v12  ;;  %v2573_v12 = vld [vmem:[#allocation8 + $0x1d8] sm:$0xff] }
 0x50b   :  { %1427 = vmatpush.bf16.msrb.mxu3 %v2574_v11  ;;  %v2604_v11 = vld [vmem:[#allocation8 + $0x250] sm:$0xff] }
 0x50c   :  { %931 = vmatmul.bf16.vlgmr.msra.gmra.mxu1 %v871_v13  ;;  %v2633_v13 = vld [vmem:[#allocation10 + $0x6] ss:$0 sm:$0xff] }
 0x50d   :  { %1591 = vmatpush.bf16.msra.mxu1 %v2593_v36 }
 0x50f   :  { %1428 = vmatpush.bf16.msrb.mxu3 %v2573_v12  ;;  %v2603_v12 = vld [vmem:[#allocation8 + $0x248] sm:$0xff] }
 0x513   :  { %1429 = vmatpush.bf16.msrb.mxu3 %v2572_v19 }
 0x517   :  { %1430 = vmatpush.bf16.msrb.mxu3 %v2571_v20  ;;  %v2639_v20 = vld [vmem:[#allocation10 + $0x9] ss:$0 sm:$0xff] }
 0x589   :  { %v932_v22 = vpop.f32.mrf.mxu1 }
 0x58a   :  { %v933_v23 = vadd.f32 %v2629_v21, %v932_v22  ;;  %v2570_v21 = vld [vmem:[#allocation8 + $0x1c0] sm:$0xff]  ;;  %v2585_v22 = vld [vmem:[#allocation5 + $0x238] sm:$0xff] }
 0x58b   :  { %1431 = vmatpush.bf16.msrb.mxu3 %v2570_v21  ;;  %1525 = vmatpush.bf16.msra.mxu0 %v2585_v22 }
 0x58c   :  { %v936_v24 = vadd.f32 %v933_v23, %v769_v60  ;;  %v2567_v60 = vld [vmem:[#allocation5 + $0x1e8] sm:$0xff]  ;;  %v2584_v23 = vld [vmem:[#allocation5 + $0x230] sm:$0xff] }
 0x58d   :  { %1360 = vmatpush.bf16.msrb.mxu2 %v2567_v60 }
 0x58e   :  { %v972_v25 = vpack.c.bf16 %v936_v24, %v936_v24 }
 0x58f   :  { %1526 = vmatpush.bf16.msra.mxu0 %v2584_v23 }
 0x590   :  { %1032 = vmatmul.bf16.vlgmr.msra.gmra.mxu2 %v972_v25  ;;  %v2582_v25 = vld [vmem:[#allocation5 + $0x220] sm:$0xff] }
 0x591   :  { %v934_v26 = vpop.f32.mrf.mxu1  ;;  %1361 = vmatpush.bf16.msrb.mxu2 %v2566_v61 }
 0x592   :  { %v2581_v26 = vld [vmem:[#allocation5 + $0x218] sm:$0xff] }
 0x595   :  { %1362 = vmatpush.bf16.msrb.mxu2 %v2565_v62  ;;  %v2595_v62 = vld [vmem:[#allocation5 + $0x248] sm:$0xff] }
 0x599   :  { %1363 = vmatpush.bf16.msrb.mxu2 %v2564_v0  ;;  %v2609_v0 = vld [vmem:[#allocation8 + $0x278] sm:$0xff] }
 0x59d   :  { %1364 = vmatpush.bf16.msrb.mxu2 %v2563_v6 }
 0x5a1   :  { %1365 = vmatpush.bf16.msrb.mxu2 %v2562_v7 }
 0x613   :  { %v1033_v37 = vpop.f32.mrf.mxu2 }
 0x614   :  { %v1034_v38 = vadd.f32 %v2630_v35, %v1033_v37  ;;  %v2578_v35 = vld [vmem:[#allocation5 + $0x200] sm:$0xff] }
 0x615   :  { %v2592_v37 = vld [vmem:[#allocation8 + $0x230] sm:$0xff] }
 0x616   :  { %2650 = vtanh.f32 %v1034_v38  ;;  %1592 = vmatpush.bf16.msra.mxu1 %v2592_v37  ;;  %v2591_v38 = vld [vmem:[#allocation8 + $0x228] sm:$0xff] }
 0x61a   :  { %1593 = vmatpush.bf16.msra.mxu1 %v2591_v38 }
 0x61b   :  { %v1035_v39 = vpop.f32.mrf.mxu2 }
 0x61c   :  { %v2651_v40 = vpop.eup %2650  ;;  %v2590_v39 = vld [vmem:[#allocation8 + $0x220] sm:$0xff] }
 0x61d   :  { %v1038_v41 = vpack.c.bf16 %v2651_v40, %v2651_v40  ;;  %v2589_v40 = vld [vmem:[#allocation8 + $0x218] sm:$0xff] }
 0x61e   :  { %1594 = vmatpush.bf16.msra.mxu1 %v2590_v39 }
 0x61f   :  { %1098 = vmatmul.bf16.vlgmr.msra.gmra.mxu3 %v1038_v41  ;;  %v2635_v41 = vld [vmem:[#allocation10 + $0x7] ss:$0 sm:$0xff] }
 0x620   :  { %1758 = vmatpush.bf16.msra.mxu3 %v2609_v0 }
 0x622   :  { %1595 = vmatpush.bf16.msra.mxu1 %v2589_v40 }
 0x626   :  { %1596 = vmatpush.bf16.msra.mxu1 %v2588_v47 }
 0x62a   :  { %1597 = vmatpush.bf16.msra.mxu1 %v2587_v48 }
 0x6a2   :  { %v1099_v50 = vpop.f32.mrf.mxu3 }
 0x6a3   :  { %v1100_v51 = vadd.f32 %v2631_v49, %v1099_v50  ;;  %v2586_v49 = vld [vmem:[#allocation8 + $0x200] sm:$0xff]  ;;  %v2601_v50 = vld [vmem:[#allocation5 + $0x278] sm:$0xff] }
 0x6a4   :  { %1598 = vmatpush.bf16.msra.mxu1 %v2586_v49  ;;  %1692 = vmatpush.bf16.msra.mxu2 %v2601_v50 }
 0x6a5   :  { %v1103_v52 = vadd.f32 %v1100_v51, %v936_v24  ;;  %v2583_v24 = vld [vmem:[#allocation5 + $0x228] sm:$0xff]  ;;  %v2600_v51 = vld [vmem:[#allocation5 + $0x270] sm:$0xff] }
 0x6a6   :  { %1527 = vmatpush.bf16.msra.mxu0 %v2583_v24 }
 0x6a7   :  { %v1139_v53 = vpack.c.bf16 %v1103_v52, %v1103_v52 }
 0x6a8   :  { %1693 = vmatpush.bf16.msra.mxu2 %v2600_v51 }
 0x6a9   :  { %1199 = vmatmul.bf16.vlgmr.msrb.gmra.mxu0 %v1139_v53  ;;  %v2598_v53 = vld [vmem:[#allocation5 + $0x260] sm:$0xff] }
 0x6aa   :  { %v1101_v54 = vpop.f32.mrf.mxu3  ;;  %1528 = vmatpush.bf16.msra.mxu0 %v2582_v25 }
 0x6ab   :  { %v2597_v54 = vld [vmem:[#allocation5 + $0x258] sm:$0xff] }
 0x6ae   :  { %1529 = vmatpush.bf16.msra.mxu0 %v2581_v26 }
 0x6b2   :  { %1530 = vmatpush.bf16.msra.mxu0 %v2580_v28 }
 0x6b6   :  { %1531 = vmatpush.bf16.msra.mxu0 %v2579_v34 }
 0x6ba   :  { %1532 = vmatpush.bf16.msra.mxu0 %v2578_v35 }
 0x726   :  { %v1200_v1 = vpop.f32.mrf.mxu0 }
 0x727   :  { %v1201_v2 = vadd.f32 %v2632_v63, %v1200_v1  ;;  %v2594_v63 = vld [vmem:[#allocation5 + $0x240] sm:$0xff] }
 0x728   :  { %v2608_v1 = vld [vmem:[#allocation8 + $0x270] sm:$0xff] }
 0x729   :  { %2652 = vtanh.f32 %v1201_v2  ;;  %1759 = vmatpush.bf16.msra.mxu3 %v2608_v1  ;;  %v2607_v2 = vld [vmem:[#allocation8 + $0x268] sm:$0xff] }
 0x72d   :  { %1760 = vmatpush.bf16.msra.mxu3 %v2607_v2 }
 0x72e   :  { %v1202_v3 = vpop.f32.mrf.mxu0 }
 0x72f   :  { %v2653_v4 = vpop.eup %2652  ;;  %v2606_v3 = vld [vmem:[#allocation8 + $0x260] sm:$0xff] }
 0x730   :  { %v1205_v5 = vpack.c.bf16 %v2653_v4, %v2653_v4  ;;  %v2605_v4 = vld [vmem:[#allocation8 + $0x258] sm:$0xff] }
 0x731   :  { %1761 = vmatpush.bf16.msra.mxu3 %v2606_v3 }
 0x732   :  { %1265 = vmatmul.bf16.vlgmr.msrb.gmra.mxu1 %v1205_v5  ;;  %v2637_v5 = vld [vmem:[#allocation10 + $0x8] ss:$0 sm:$0xff] }
 0x735   :  { %1762 = vmatpush.bf16.msra.mxu3 %v2605_v4 }
 0x739   :  { %1763 = vmatpush.bf16.msra.mxu3 %v2604_v11 }
 0x73d   :  { %1764 = vmatpush.bf16.msra.mxu3 %v2603_v12 }
 0x7af   :  { %v1266_v14 = vpop.f32.mrf.mxu1 }
 0x7b0   :  { %v1267_v15 = vadd.f32 %v2633_v13, %v1266_v14  ;;  %v2602_v13 = vld [vmem:[#allocation8 + $0x240] sm:$0xff]  ;;  %v2638_v14 = vld [vmem:[#allocation7 + $0x9] ss:$0 sm:$0xff] }
 0x7b1   :  { %1765 = vmatpush.bf16.msra.mxu3 %v2602_v13 }
 0x7b2   :  { %v1270_v16 = vadd.f32 %v1267_v15, %v1103_v52  ;;  %v2599_v52 = vld [vmem:[#allocation5 + $0x268] sm:$0xff] }
 0x7b3   :  { %1694 = vmatpush.bf16.msra.mxu2 %v2599_v52 }
 0x7b4   :  { %v1306_v17 = vpack.c.bf16 %v1270_v16, %v1270_v16 }
 0x7b6   :  { %1366 = vmatmul.bf16.vlgmr.msrb.gmra.mxu2 %v1306_v17 }
 0x7b7   :  { %v1268_v18 = vpop.f32.mrf.mxu1  ;;  %1695 = vmatpush.bf16.msra.mxu2 %v2598_v53 }
 0x7bb   :  { %1696 = vmatpush.bf16.msra.mxu2 %v2597_v54 }
 0x7bf   :  { %1697 = vmatpush.bf16.msra.mxu2 %v2596_v56 }
 0x7c3   :  { %1698 = vmatpush.bf16.msra.mxu2 %v2595_v62 }
 0x7c7   :  { %1699 = vmatpush.bf16.msra.mxu2 %v2594_v63 }
 0x839   :  { %v1367_v29 = vpop.f32.mrf.mxu2 }
 0x83a   :  { %v1368_v30 = vadd.f32 %v2634_v27, %v1367_v29 }
 0x83c   :  { %2654 = vtanh.f32 %v1368_v30 }
 0x841   :  { %v1369_v31 = vpop.f32.mrf.mxu2 }
 0x842   :  { %v2655_v32 = vpop.eup %2654 }
 0x843   :  { %v1372_v33 = vpack.c.bf16 %v2655_v32, %v2655_v32 }
 0x845   :  { %1432 = vmatmul.bf16.vlgmr.msrb.gmra.mxu3 %v1372_v33 }
 0x8c8   :  { %v1433_v42 = vpop.f32.mrf.mxu3 }
 0x8c9   :  { %v1434_v43 = vadd.f32 %v2635_v41, %v1433_v42 }
 0x8cb   :  { %v1437_v44 = vadd.f32 %v1434_v43, %v1270_v16 }
 0x8cd   :  { %v1473_v45 = vpack.c.bf16 %v1437_v44, %v1437_v44 }
 0x8cf   :  { %1533 = vmatmul.bf16.vlgmr.msra.gmra.mxu0 %v1473_v45 }
 0x8d0   :  { %v1435_v46 = vpop.f32.mrf.mxu3 }
 0x94c   :  { %v1534_v57 = vpop.f32.mrf.mxu0 }
 0x94d   :  { %v1535_v58 = vadd.f32 %v2636_v55, %v1534_v57 }
 0x94f   :  { %2656 = vtanh.f32 %v1535_v58 }
 0x954   :  { %v1536_v59 = vpop.f32.mrf.mxu0 }
 0x955   :  { %v2657_v60 = vpop.eup %2656 }
 0x956   :  { %v1539_v61 = vpack.c.bf16 %v2657_v60, %v2657_v60 }
 0x958   :  { %1599 = vmatmul.bf16.vlgmr.msra.gmra.mxu1 %v1539_v61 }
 0x9d5   :  { %v1600_v6 = vpop.f32.mrf.mxu1 }
 0x9d6   :  { %v1601_v7 = vadd.f32 %v2637_v5, %v1600_v6 }
 0x9d8   :  { %v1604_v8 = vadd.f32 %v1601_v7, %v1437_v44 }
 0x9da   :  { %v1640_v9 = vpack.c.bf16 %v1604_v8, %v1604_v8 }
 0x9dc   :  { %1700 = vmatmul.bf16.vlgmr.msra.gmra.mxu2 %v1640_v9 }
 0x9dd   :  { %v1602_v10 = vpop.f32.mrf.mxu1 }
 0xa5f   :  { %v1701_v15 = vpop.f32.mrf.mxu2 }
 0xa60   :  { %v1702_v16 = vadd.f32 %v2638_v14, %v1701_v15 }
 0xa62   :  { %2658 = vtanh.f32 %v1702_v16 }
 0xa67   :  { %v1703_v17 = vpop.f32.mrf.mxu2 }
 0xa68   :  { %v2659_v18 = vpop.eup %2658 }
 0xa69   :  { %v1706_v19 = vpack.c.bf16 %v2659_v18, %v2659_v18 }
 0xa6b   :  { %1766 = vmatmul.bf16.vlgmr.msra.gmra.mxu3 %v1706_v19 }
 0xaee   :  { %v1767_v21 = vpop.f32.mrf.mxu3 }
 0xaef   :  { %v1768_v22 = vadd.f32 %v2639_v20, %v1767_v21 }
 0xaf1   :  { %v1771_v23 = vadd.f32 %v1768_v22, %v1604_v8 }
 0xaf3   :  { %1772 = vst [vmem:[#allocation11] sm:$0xff] %v1771_v23 }
 0xaf4   :  { %1783 = dma.vmem_to_hbm [thread:$0]  %s1779_s4, 128, %s1781_s21, [#allocation4]  }
 0xaf6   :  { %v1769_v24 = vpop.f32.mrf.mxu3 }
 0xaf7   :  { %2810 = dma.done.wait [#allocation4], 128  }
 0xaf8   :  { %2811 = vsyncadd [#allocation4], 4294967168 }
 0xaf9   :  { %1788 = vsyncpa [#allocation3], 1 }
 0xafa   :  { %1789 = vsyncpa [#allocation6], 1 }
 0xafb   :  { %1790 = vsyncpa [#allocation9], 1 }
 0xafc   :  { %1791 = vsyncpa [#allocation4], 1 }

</bundles_post_ra>
